<compile_context>
chip_gen: v7x
topology: tpu7x:2x2x1
jax: 0.10.0
libtpu: 0.0.40
codegen_flags: <defaults>
</compile_context>

<pallas_src>
import jax
import jax.numpy as jnp
from jax import lax
from jax.experimental import pallas as pl
from jax.experimental.pallas import tpu as pltpu


def _round_up(x, m):
    return (x + m - 1) // m * m


def _vmem_capacity_bytes():
    """Physical per-core VMEM; falls back to the smallest generation (64 MiB)."""
    try:
        cap = getattr(pltpu.get_tpu_info(), "vmem_capacity_bytes", None)
        if cap:
            return int(cap)
    except Exception:
        pass
    return 64 * 1024 * 1024


def _moe_grouped_kernel(fetch_row_ref, fetch_e_ref, active_ref,    # SMEM (prefetched)
                        x_ref, w1g_ref, w1u_ref, w2_ref, wgt_ref,  # VMEM inputs
                        o_ref,                                     # VMEM output
                        acc_ref):                                  # f32 scratch (tm, H)
    t = pl.program_id(0)               # grouped row tile (one expert per tile)
    n = pl.program_id(1)               # intermediate tile (reduction, innermost)
    last_n = pl.num_programs(1) - 1

    @pl.when(n == 0)
    def _init():
        acc_ref[...] = jnp.zeros_like(acc_ref)

    @pl.when(active_ref[t] != 0)
    def _body():
        x = x_ref[...]                                             # (tm, H)
        dims = (((1,), (1,)), ((), ()))                            # contract last axes
        gate = lax.dot_general(x, w1g_ref[...], dims,
                               preferred_element_type=jnp.float32)  # (tm, tn)
        up = lax.dot_general(x, w1u_ref[...], dims,
                             preferred_element_type=jnp.float32)    # (tm, tn)
        act = up * (gate * jax.nn.sigmoid(gate))                   # SiLU(gate)*up, f32
        act = act * wgt_ref[...]                                   # * routing weight (tm,1) f32
        acc_ref[...] += lax.dot_general(act.astype(w2_ref.dtype), w2_ref[...], dims,
                                        preferred_element_type=jnp.float32)  # (tm, H)

    @pl.when(n == last_n)
    def _finalize():
        o_ref[...] = acc_ref[...].astype(o_ref.dtype)


def loop_moe_forward(hidden_states, w1, w2, router_w, topk=2,
                     expert_map=None, renormalize=False,
                     block_tokens=1024, block_inter=512):
    """Grouped-GEMM Pallas implementation of LoopMoE.forward.

    hidden_states: [..., H];  w1: [E, 2*I, H];  w2: [E, H, I];  router_w: [E, H]
    """
    orig_shape = hidden_states.shape
    H = orig_shape[-1]
    dtype = hidden_states.dtype
    x = hidden_states.reshape(-1, H)
    T = x.shape[0]
    E, two_i, _ = w1.shape
    I = two_i // 2
    K = topk

    # ------------------------- router (plain JAX glue) ------------------------
    gating = x @ router_w.T                                         # [T, E]
    probs = jax.nn.softmax(gating.astype(jnp.float32), axis=-1)
    topk_w, sel = lax.top_k(probs, K)                               # [T, K] f32 / int32
    if renormalize:
        topk_w = topk_w / topk_w.sum(axis=-1, keepdims=True)
    # routing weights stay f32 end-to-end (cheap precision win)
    if expert_map is not None:
        sel = expert_map[sel]
    sel = sel.astype(jnp.int32)

    # ----------------------------- tile selection -----------------------------
    in_b = jnp.dtype(dtype).itemsize
    w_b = jnp.dtype(w1.dtype).itemsize
    sub = max(8, 32 // in_b)            # sublane multiple: 8 f32 / 16 bf16 / 32 int8
    pairs = T * K

    if I % 128 == 0:
        # zero-copy weight path: tn must divide I so gate/up/w2 tile on block bounds
        tn = max(128, min(block_inter, I) // 128 * 128)
        while I % tn != 0:
            tn -= 128
        zero_copy = True
    else:
        tn = max(128, min(block_inter, _round_up(I, 128)) // 128 * 128)
        zero_copy = False

    def _shrink_tn(cur):
        c = cur - 128
        while c >= 128:
            if (not zero_copy) or (I % c == 0):
                return c
            c -= 128
        return cur

    tm = max(sub, min(_round_up(block_tokens, sub), _round_up(pairs, sub)))

    vmem_cap = _vmem_capacity_bytes()
    budget = (vmem_cap * 9) // 10       # leave headroom below physical VMEM

    def _est(tm_, tn_):
        h_l = _round_up(H, 128)
        tn_l = _round_up(tn_, 128)
        return (2 * tm_ * h_l * in_b          # x tile (double-buffered)
                + 2 * 2 * tn_l * h_l * w_b    # w1 gate + up tiles
                + 2 * h_l * tn_l * w_b        # w2 tile
                + 2 * tm_ * 128 * 4           # f32 routing column (lane-padded)
                + 2 * tm_ * h_l * in_b        # output tile
                + tm_ * h_l * 4               # f32 accumulator scratch
                + 4 * tm_ * tn_l * 4)         # in-kernel f32 temporaries

    while _est(tm, tn) > budget:
        if tm > 256:
            tm = max(sub, _round_up(tm // 2, sub))
        else:
            t2 = _shrink_tn(tn)
            if t2 != tn:
                tn = t2
            elif tm > sub:
                tm = max(sub, _round_up(tm // 2, sub))
            else:
                break

    i_pad = I if zero_copy else _round_up(I, tn)
    i_tiles = i_pad // tn

    # -------------- group (token, expert) pairs by expert, pad to tm ----------
    flat_e = sel.reshape(-1)                                        # [T*K]
    flat_t = jnp.repeat(jnp.arange(T, dtype=jnp.int32), K)          # [T*K]
    flat_w = topk_w.reshape(-1).astype(jnp.float32)                 # [T*K]

    order = jnp.argsort(flat_e)
    sorted_e = flat_e[order]
    sorted_t = flat_t[order]
    sorted_w = flat_w[order]

    counts = jnp.zeros((E,), jnp.int32).at[flat_e].add(1)
    padded_counts = (counts + tm - 1) // tm * tm
    cum_u = jnp.concatenate([jnp.zeros((1,), jnp.int32), jnp.cumsum(counts)[:-1]])
    cum_p = jnp.concatenate([jnp.zeros((1,), jnp.int32), jnp.cumsum(padded_counts)[:-1]])
    total_padded = jnp.sum(padded_counts)

    # destination row of each sorted pair inside the group-padded layout
    dest = cum_p[sorted_e] + (jnp.arange(pairs, dtype=jnp.int32) - cum_u[sorted_e])

    # static upper bound on the padded row count (multiple of tm)
    rows = _round_up(pairs + min(E, pairs) * (tm - 1), tm)
    num_tiles = rows // tm

    token_for_row = jnp.zeros((rows,), jnp.int32).at[dest].set(sorted_t)
    wgt_for_row = jnp.zeros((rows,), jnp.float32).at[dest].set(sorted_w)

    x_grouped = jnp.take(x, token_for_row, axis=0)                  # [rows, H]
    wgt_col = wgt_for_row[:, None]                                  # [rows, 1] f32

    tile_start = jnp.arange(num_tiles, dtype=jnp.int32) * tm
    e_for_tile = jnp.clip(jnp.searchsorted(cum_p, tile_start, side="right") - 1,
                          0, E - 1).astype(jnp.int32)
    tile_active = (tile_start < total_padded).astype(jnp.int32)
    last_active = jnp.maximum(total_padded // tm - 1, 0).astype(jnp.int32)
    # Trailing all-padding tiles repeat the last active tile's block indices so
    # Pallas elides their weight / activation DMAs entirely.
    fetch_e = jnp.where(tile_active == 1, e_for_tile,
                        e_for_tile[last_active]).astype(jnp.int32)
    fetch_row = jnp.where(tile_active == 1, jnp.arange(num_tiles, dtype=jnp.int32),
                          last_active).astype(jnp.int32)

    # ------------------------------ weight specs -------------------------------
    frozen_n = i_tiles - 1

    def _nn(n, a):
        # active tile -> n; padding tile -> previous tile's last n (repeat block idx)
        return n * a + (1 - a) * frozen_n

    if zero_copy:
        # w1 passed unsplit twice: gate rows are blocks [0, I/tn), up rows follow.
        up_off = I // tn
        w1_gate_in, w1_up_in, w2_in = w1, w1, w2

        def w1g_map(t, n, fr, fe, act):
            return (fe[t], _nn(n, act[t]), 0)

        def w1u_map(t, n, fr, fe, act):
            return (fe[t], _nn(n, act[t]) + up_off, 0)

        def w2_map(t, n, fr, fe, act):
            return (fe[t], 0, _nn(n, act[t]))
    else:
        # odd intermediate size: one-time split + pad copy (small-shape fallback)
        w1_gate_in = jnp.pad(w1[:, :I, :], ((0, 0), (0, i_pad - I), (0, 0)))
        w1_up_in = jnp.pad(w1[:, I:, :], ((0, 0), (0, i_pad - I), (0, 0)))
        w2_in = jnp.pad(w2, ((0, 0), (0, 0), (0, i_pad - I)))

        def w1g_map(t, n, fr, fe, act):
            return (fe[t], _nn(n, act[t]), 0)

        w1u_map = w1g_map

        def w2_map(t, n, fr, fe, act):
            return (fe[t], 0, _nn(n, act[t]))

    vmem_limit = int(min(max(_est(tm, tn) * 5 // 4, 32 << 20), budget))

    out_grouped = pl.pallas_call(
        _moe_grouped_kernel,
        out_shape=jax.ShapeDtypeStruct((rows, H), dtype),
        grid_spec=pltpu.PrefetchScalarGridSpec(
            num_scalar_prefetch=3,
            grid=(num_tiles, i_tiles),
            in_specs=[
                # grouped activations (resident across the intermediate axis)
                pl.BlockSpec((tm, H), lambda t, n, fr, fe, act: (fr[t], 0)),
                # w1 gate tile [tn, H]
                pl.BlockSpec((None, tn, H), w1g_map),
                # w1 up tile [tn, H]
                pl.BlockSpec((None, tn, H), w1u_map),
                # w2 tile [H, tn]
                pl.BlockSpec((None, H, tn), w2_map),
                # per-row routing weight column [tm, 1] (f32)
                pl.BlockSpec((tm, 1), lambda t, n, fr, fe, act: (t, 0)),
            ],
            out_specs=pl.BlockSpec((tm, H), lambda t, n, fr, fe, act: (t, 0)),
            scratch_shapes=[pltpu.VMEM((tm, H), jnp.float32)],
        ),
        compiler_params=pltpu.CompilerParams(
            dimension_semantics=("parallel", "arbitrary"),
            vmem_limit_bytes=vmem_limit),
    )(fetch_row, fetch_e, tile_active, x_grouped, w1_gate_in, w1_up_in, w2_in, wgt_col)

    # combine the top-k per-pair contributions back into token order (f32 accumulate)
    out = jnp.zeros((T, H), jnp.float32).at[token_for_row].add(
        out_grouped.astype(jnp.float32))
    return out.astype(dtype).reshape(orig_shape)


def loop_moe_reference(hidden_states, w1, w2, router_w, topk=2,
                       expert_map=None, renormalize=False):
    """Pure-JAX reference mirroring the PyTorch loop for correctness checking."""
    orig_shape = hidden_states.shape
    hidden_size = orig_shape[-1]
    dtype = hidden_states.dtype
    x = hidden_states.reshape(-1, hidden_size)
    num_experts = w1.shape[0]
    inter = w1.shape[1] // 2

    gating = x @ router_w.T
    probs = jax.nn.softmax(gating.astype(jnp.float32), axis=-1)
    topk_w, sel = lax.top_k(probs, topk)
    if renormalize:
        topk_w = topk_w / topk_w.sum(axis=-1, keepdims=True)
    topk_w = topk_w.astype(dtype)
    if expert_map is not None:
        sel = expert_map[sel]

    out = jnp.zeros(x.shape, jnp.float32)
    for e in range(num_experts):
        mask = (sel == e)
        ew = (topk_w * mask).sum(axis=-1, keepdims=True)
        h = x @ w1[e].T
        gate = jax.nn.silu(h[:, :inter])
        a = h[:, inter:] * gate
        y = a @ w2[e].T
        out = out + (y * ew).astype(jnp.float32)
    return out.astype(dtype).reshape(orig_shape)


if __name__ == "__main__":
    fwd = jax.jit(loop_moe_forward,
                  static_argnames=("topk", "renormalize",
                                   "block_tokens", "block_inter"))

    def _make_inputs(batch, seq, hidden, inter, experts, dtype):
        key = jax.random.PRNGKey(0)
        k_x, k_w1, k_w2, k_r = jax.random.split(key, 4)
        w1 = (0.02 * jax.random.normal(k_w1, (experts, inter * 2, hidden))).astype(dtype)
        w2 = (0.02 * jax.random.normal(k_w2, (experts, hidden, inter))).astype(dtype)
        rw = (0.02 * jax.random.normal(k_r, (experts, hidden))).astype(dtype)
        x = jax.random.normal(k_x, (batch, seq, hidden)).astype(dtype)
        return x, w1, w2, rw

    # ---- test 1: small f32 config (exercises the pad/split fallback path) ----
    x, w1, w2, rw = _make_inputs(batch=2, seq=8, hidden=32, inter=64,
                                 experts=4, dtype=jnp.float32)
    out = jax.block_until_ready(fwd(x, w1, w2, rw, topk=2))
    ref = loop_moe_reference(x, w1, w2, rw, topk=2)
    assert out.shape == x.shape
    err = float(jnp.max(jnp.abs(out - ref)))
    assert jnp.allclose(out, ref, atol=2e-5, rtol=1e-3), f"max abs err = {err}"

    # ---- test 2: zero-copy weight path, 2 intermediate tiles, renormalize ----
    x2, w1b, w2b, rwb = _make_inputs(batch=2, seq=16, hidden=128, inter=256,
                                     experts=4, dtype=jnp.float32)
    out2 = jax.block_until_ready(
        fwd(x2, w1b, w2b, rwb, topk=2, renormalize=True, block_inter=128))
    ref2 = loop_moe_reference(x2, w1b, w2b, rwb, topk=2, renormalize=True)
    assert out2.shape == x2.shape
    err2 = float(jnp.max(jnp.abs(out2 - ref2)))
    assert jnp.allclose(out2, ref2, atol=2e-5, rtol=1e-3), f"max abs err = {err2}"

    # ---- test 3: bf16 path (half HBM traffic; accumulation stays f32) --------
    out_bf16 = jax.block_until_ready(
        fwd(x.astype(jnp.bfloat16), w1.astype(jnp.bfloat16),
            w2.astype(jnp.bfloat16), rw.astype(jnp.bfloat16), topk=2))
    assert out_bf16.shape == x.shape
    assert bool(jnp.all(jnp.isfinite(out_bf16.astype(jnp.float32))))

    print("KERNEL_OK")
</pallas_src>

<mosaic_0001>
module attributes {stable_mosaic.version = 11 : i64} {
  func.func private @main(%arg0: i32) attributes {dimension_semantics = [#tpu.dimension_semantics<core_parallel>], iteration_bounds = array<i64: 2>, tpu.core_type = #tpu.core_type<sc_scalar_subcore>, window_params = []} {
    return
  }
}

module attributes {stable_mosaic.version = 11 : i64} {
  func.func private @main(%arg0: i32) attributes {dimension_semantics = [#tpu.dimension_semantics<core_parallel>], iteration_bounds = array<i64: 2>, tpu.core_type = #tpu.core_type<sc_scalar_subcore>, window_params = []} {
    return
  }
}

module attributes {stable_mosaic.version = 11 : i64} {
  func.func @_moe_grouped_kernel(%arg0: i32, %arg1: i32, %arg2: memref<5xi32, #tpu.memory_space<smem>>, %arg3: memref<5xi32, #tpu.memory_space<smem>>, %arg4: memref<5xi32, #tpu.memory_space<smem>>, %arg5: memref<32x32xf32, #tpu.memory_space<vmem>>, %arg6: memref<1x128x32xf32, #tpu.memory_space<vmem>>, %arg7: memref<1x128x32xf32, #tpu.memory_space<vmem>>, %arg8: memref<1x32x128xf32, #tpu.memory_space<vmem>>, %arg9: memref<32x1xf32, #tpu.memory_space<vmem>>, %arg10: memref<32x32xf32, #tpu.memory_space<vmem>>, %arg11: memref<32x32xf32, #tpu.memory_space<vmem>>) attributes {dimension_semantics = [#tpu.dimension_semantics<parallel>, #tpu.dimension_semantics<arbitrary>], iteration_bounds = array<i64: 5, 1>, scalar_prefetch = 3 : i64, scratch_operands = 1 : i64, tpu.core_type = #tpu.core_type<tc>, window_params = [{transform_indices = @transform_0, window_bounds = array<i64: 32, 32>}, {transform_indices = @transform_1, window_bounds = array<i64: 1, 128, 32>}, {transform_indices = @transform_2, window_bounds = array<i64: 1, 128, 32>}, {transform_indices = @transform_3, window_bounds = array<i64: 1, 32, 128>}, {transform_indices = @transform_4, window_bounds = array<i64: 32, 1>}, {transform_indices = @transform_5, window_bounds = array<i64: 32, 32>}]} {
    %c0_i32 = arith.constant 0 : i32
    %0 = arith.cmpi eq, %arg1, %c0_i32 : i32
    %1 = arith.extui %0 : i1 to i32
    %c0_i32_0 = arith.constant 0 : i32
    %2 = arith.cmpi ne, %1, %c0_i32_0 : i32
    scf.if %2 {
      %cst = arith.constant 0.000000e+00 : f32
      %11 = vector.broadcast %cst : f32 to vector<32x32xf32>
      %c0 = arith.constant 0 : index
      %c0_5 = arith.constant 0 : index
      %12 = vector.load %arg11[%c0, %c0_5] : memref<32x32xf32, #tpu.memory_space<vmem>>, vector<32x32xf32>
      tpu.vector_store %arg11[%c0, %c0_5], %11 {strides = array<i32>} : memref<32x32xf32, #tpu.memory_space<vmem>>, vector<32x32xf32>,
    } else {
    }
    %3 = arith.index_cast %arg0 : i32 to index
    %4 = memref.load %arg4[%3] : memref<5xi32, #tpu.memory_space<smem>>
    %c0_i32_1 = arith.constant 0 : i32
    %5 = arith.cmpi ne, %4, %c0_i32_1 : i32
    %6 = arith.extui %5 : i1 to i32
    %c0_i32_2 = arith.constant 0 : i32
    %7 = arith.cmpi ne, %6, %c0_i32_2 : i32
    scf.if %7 {
      %c0 = arith.constant 0 : index
      %c0_5 = arith.constant 0 : index
      %11 = vector.load %arg5[%c0, %c0_5] : memref<32x32xf32, #tpu.memory_space<vmem>>, vector<32x32xf32>
      %c0_6 = arith.constant 0 : index
      %c0_7 = arith.constant 0 : index
      %c0_8 = arith.constant 0 : index
      %12 = vector.load %arg6[%c0_6, %c0_7, %c0_8] : memref<1x128x32xf32, #tpu.memory_space<vmem>>, vector<1x128x32xf32>
      %13 = vector.shape_cast %12 : vector<1x128x32xf32> to vector<128x32xf32>
      %cst = arith.constant dense<0.000000e+00> : vector<32x128xf32>
      %14 = tpu.matmul %11, %13, %cst {dimension_numbers = #tpu.dot_dimension_numbers<[1], [1], [0], [0], [0, 0, 1, 0], [], []>} : vector<32x32xf32>, vector<128x32xf32>, vector<32x128xf32> -> vector<32x128xf32>
      %c0_9 = arith.constant 0 : index
      %c0_10 = arith.constant 0 : index
      %c0_11 = arith.constant 0 : index
      %15 = vector.load %arg7[%c0_9, %c0_10, %c0_11] : memref<1x128x32xf32, #tpu.memory_space<vmem>>, vector<1x128x32xf32>
      %16 = vector.shape_cast %15 : vector<1x128x32xf32> to vector<128x32xf32>
      %cst_12 = arith.constant dense<0.000000e+00> : vector<32x128xf32>
      %17 = tpu.matmul %11, %16, %cst_12 {dimension_numbers = #tpu.dot_dimension_numbers<[1], [1], [0], [0], [0, 0, 1, 0], [], []>} : vector<32x32xf32>, vector<128x32xf32>, vector<32x128xf32> -> vector<32x128xf32>
      %18 = arith.negf %14 : vector<32x128xf32>
      %19 = math.exp %18 : vector<32x128xf32>
      %cst_13 = arith.constant 1.000000e+00 : f32
      %20 = vector.broadcast %cst_13 : f32 to vector<32x128xf32>
      %21 = arith.addf %20, %19 : vector<32x128xf32>
      %22 = arith.divf %20, %21 : vector<32x128xf32>
      %23 = arith.mulf %14, %22 : vector<32x128xf32>
      %24 = arith.mulf %17, %23 : vector<32x128xf32>
      %c0_14 = arith.constant 0 : index
      %c0_15 = arith.constant 0 : index
      %25 = vector.load %arg9[%c0_14, %c0_15] : memref<32x1xf32, #tpu.memory_space<vmem>>, vector<32x1xf32>
      %26 = vector.broadcast %25 : vector<32x1xf32> to vector<32x128xf32>
      %27 = arith.mulf %24, %26 : vector<32x128xf32>
      %c0_16 = arith.constant 0 : index
      %c0_17 = arith.constant 0 : index
      %28 = vector.load %arg11[%c0_16, %c0_17] : memref<32x32xf32, #tpu.memory_space<vmem>>, vector<32x32xf32>
      %c0_18 = arith.constant 0 : index
      %c0_19 = arith.constant 0 : index
      %c0_20 = arith.constant 0 : index
      %29 = vector.load %arg8[%c0_18, %c0_19, %c0_20] : memref<1x32x128xf32, #tpu.memory_space<vmem>>, vector<1x32x128xf32>
      %30 = vector.shape_cast %29 : vector<1x32x128xf32> to vector<32x128xf32>
      %cst_21 = arith.constant dense<0.000000e+00> : vector<32x32xf32>
      %31 = tpu.matmul %27, %30, %cst_21 {dimension_numbers = #tpu.dot_dimension_numbers<[1], [1], [0], [0], [0, 0, 1, 0], [], []>} : vector<32x128xf32>, vector<32x128xf32>, vector<32x32xf32> -> vector<32x32xf32>
      %32 = arith.addf %28, %31 : vector<32x32xf32>
      %c0_22 = arith.constant 0 : index
      %c0_23 = arith.constant 0 : index
      %33 = vector.load %arg11[%c0_22, %c0_23] : memref<32x32xf32, #tpu.memory_space<vmem>>, vector<32x32xf32>
      tpu.vector_store %arg11[%c0_22, %c0_23], %32 {strides = array<i32>} : memref<32x32xf32, #tpu.memory_space<vmem>>, vector<32x32xf32>,
    } else {
    }
    %c0_i32_3 = arith.constant 0 : i32
    %8 = arith.cmpi eq, %arg1, %c0_i32_3 : i32
    %9 = arith.extui %8 : i1 to i32
    %c0_i32_4 = arith.constant 0 : i32
    %10 = arith.cmpi ne, %9, %c0_i32_4 : i32
    scf.if %10 {
      %c0 = arith.constant 0 : index
      %c0_5 = arith.constant 0 : index
      %11 = vector.load %arg11[%c0, %c0_5] : memref<32x32xf32, #tpu.memory_space<vmem>>, vector<32x32xf32>
      %c0_6 = arith.constant 0 : index
      %c0_7 = arith.constant 0 : index
      %12 = vector.load %arg10[%c0_6, %c0_7] : memref<32x32xf32, #tpu.memory_space<vmem>>, vector<32x32xf32>
      tpu.vector_store %arg10[%c0_6, %c0_7], %11 {strides = array<i32>} : memref<32x32xf32, #tpu.memory_space<vmem>>, vector<32x32xf32>,
    } else {
    }
    return
  }
  func.func @transform_0(%arg0: i32, %arg1: i32, %arg2: memref<5xi32, #tpu.memory_space<smem>>, %arg3: memref<5xi32, #tpu.memory_space<smem>>, %arg4: memref<5xi32, #tpu.memory_space<smem>>) -> (i32, i32) {
    %0 = arith.index_cast %arg0 : i32 to index
    %1 = memref.load %arg2[%0] : memref<5xi32, #tpu.memory_space<smem>>
    %c0_i32 = arith.constant 0 : i32
    %c0_i32_0 = arith.constant 0 : i32
    return %1, %c0_i32 : i32, i32
  }
  func.func @transform_1(%arg0: i32, %arg1: i32, %arg2: memref<5xi32, #tpu.memory_space<smem>>, %arg3: memref<5xi32, #tpu.memory_space<smem>>, %arg4: memref<5xi32, #tpu.memory_space<smem>>) -> (i32, i32, i32) {
    %0 = arith.index_cast %arg0 : i32 to index
    %1 = memref.load %arg3[%0] : memref<5xi32, #tpu.memory_space<smem>>
    %2 = arith.index_cast %arg0 : i32 to index
    %3 = memref.load %arg4[%2] : memref<5xi32, #tpu.memory_space<smem>>
    %4 = arith.muli %arg1, %3 : i32
    %c1_i32 = arith.constant 1 : i32
    %5 = arith.subi %c1_i32, %3 : i32
    %c0_i32 = arith.constant 0 : i32
    %6 = arith.muli %5, %c0_i32 : i32
    %7 = arith.addi %4, %6 : i32
    %c0_i32_0 = arith.constant 0 : i32
    %c0_i32_1 = arith.constant 0 : i32
    return %1, %7, %c0_i32_0 : i32, i32, i32
  }
  func.func @transform_2(%arg0: i32, %arg1: i32, %arg2: memref<5xi32, #tpu.memory_space<smem>>, %arg3: memref<5xi32, #tpu.memory_space<smem>>, %arg4: memref<5xi32, #tpu.memory_space<smem>>) -> (i32, i32, i32) {
    %0 = arith.index_cast %arg0 : i32 to index
    %1 = memref.load %arg3[%0] : memref<5xi32, #tpu.memory_space<smem>>
    %2 = arith.index_cast %arg0 : i32 to index
    %3 = memref.load %arg4[%2] : memref<5xi32, #tpu.memory_space<smem>>
    %4 = arith.muli %arg1, %3 : i32
    %c1_i32 = arith.constant 1 : i32
    %5 = arith.subi %c1_i32, %3 : i32
    %c0_i32 = arith.constant 0 : i32
    %6 = arith.muli %5, %c0_i32 : i32
    %7 = arith.addi %4, %6 : i32
    %c0_i32_0 = arith.constant 0 : i32
    %c0_i32_1 = arith.constant 0 : i32
    return %1, %7, %c0_i32_0 : i32, i32, i32
  }
  func.func @transform_3(%arg0: i32, %arg1: i32, %arg2: memref<5xi32, #tpu.memory_space<smem>>, %arg3: memref<5xi32, #tpu.memory_space<smem>>, %arg4: memref<5xi32, #tpu.memory_space<smem>>) -> (i32, i32, i32) {
    %0 = arith.index_cast %arg0 : i32 to index
    %1 = memref.load %arg3[%0] : memref<5xi32, #tpu.memory_space<smem>>
    %2 = arith.index_cast %arg0 : i32 to index
    %3 = memref.load %arg4[%2] : memref<5xi32, #tpu.memory_space<smem>>
    %4 = arith.muli %arg1, %3 : i32
    %c1_i32 = arith.constant 1 : i32
    %5 = arith.subi %c1_i32, %3 : i32
    %c0_i32 = arith.constant 0 : i32
    %6 = arith.muli %5, %c0_i32 : i32
    %7 = arith.addi %4, %6 : i32
    %c0_i32_0 = arith.constant 0 : i32
    %c0_i32_1 = arith.constant 0 : i32
    return %1, %c0_i32_0, %7 : i32, i32, i32
  }
  func.func @transform_4(%arg0: i32, %arg1: i32, %arg2: memref<5xi32, #tpu.memory_space<smem>>, %arg3: memref<5xi32, #tpu.memory_space<smem>>, %arg4: memref<5xi32, #tpu.memory_space<smem>>) -> (i32, i32) {
    %c0_i32 = arith.constant 0 : i32
    %c0_i32_0 = arith.constant 0 : i32
    return %arg0, %c0_i32 : i32, i32
  }
  func.func @transform_5(%arg0: i32, %arg1: i32, %arg2: memref<5xi32, #tpu.memory_space<smem>>, %arg3: memref<5xi32, #tpu.memory_space<smem>>, %arg4: memref<5xi32, #tpu.memory_space<smem>>) -> (i32, i32) {
    %c0_i32 = arith.constant 0 : i32
    %c0_i32_0 = arith.constant 0 : i32
    return %arg0, %c0_i32 : i32, i32
  }
}

</mosaic_0001>

<bundles_post_ra>
// kernel: custom-call
= control target key start
LH: loop header
LB: loop body
LE: loop exit
PB: predicated region body
PF: predicated region fallthrough
CT: control target
= control target key end

     0   :  { %s6_s0 = inlined_call_operand.vmem [shape: u32[5], index: 0, kind: output, shape index: {}]  }

// kernel: loop_moe_forward.1
= control target key start
LH: loop header
LB: loop body
LE: loop exit
PB: predicated region body
PF: predicated region fallthrough
CT: control target
= control target key end

     0   :  { %s1761_s0 = inlined_call_operand.vmem [shape: s32[5], index: 0, kind: input, shape index: {}]   ;;  %s1762_s3 = inlined_call_operand.vmem [shape: f32[160,32], index: 3, kind: input, shape index: {}]   ;;  %s1763_s4 = inlined_call_operand.vmem [shape: f32[4,128,32], index: 4, kind: input, shape index: {}]   ;;  %s1764_s5 = inlined_call_operand.vmem [shape: f32[4,128,32], index: 5, kind: input, shape index: {}]   ;;  %s1765_s6 = inlined_call_operand.vmem [shape: f32[4,32,128], index: 6, kind: input, shape index: {}]   ;;  %s1766_s7 = inlined_call_operand.vmem [shape: f32[160,1], index: 7, kind: input, shape index: {}]   ;;  %s1767_s8 = inlined_call_operand.vmem [shape: f32[160,32], index: 8, kind: output, shape index: {}]   ;;  %s1768_s1 = inlined_call_operand.vmem [shape: s32[5], index: 1, kind: input, shape index: {}]   ;;  %s1769_s2 = inlined_call_operand.vmem [shape: s32[5], index: 2, kind: input, shape index: {}]  }
   0x1   :  { %s13_s29 = sshll.u32 %s1761_s0, 4  ;;  %s17_s10 = sshll.u32 %s1768_s1, 4  ;;  %s14_s29 = int_to_ptr.vmem [resolvable:$true] %s13_s29  ;;  %s18_s10 = int_to_ptr.vmem [resolvable:$true] %s17_s10 }
   0x2   :  { %s1445_s11 = scalar_lea.vmem %s14_s29, 16  ;;  %p1450_p1 = scmp.lt.s32.totalorder %s14_s29, %s14_s29 }
   0x3   :  { %p1446_p0 = scmp.ne.s32.totalorder %s14_s29, %s1445_s11  ;;  %p1451_p2 = scmp.lt.s32.totalorder %s1445_s11, %s1445_s11 }
   0x5   :  { %p1452_p3 = por %p1451_p2, %p1450_p1 }
   0x7   :  { %p1453_p4 = pnand %p1452_p3, %p1446_p0 }
   0x9   :  { %1456 = shalt.err (!%p1453_p4)  }
   0xa   :  { %s1507_s12 = smov [#allocation4]   ;;  %s1457_s13 = scalar_lea.vmem %s18_s10, 16 }
   0xb   :  { %16 = dma.vmem_to_smem %s14_s29, 16, %s1507_s12, [#allocation3] }
   0xc   :  { %p1458_p5 = scmp.ne.s32.totalorder %s18_s10, %s1457_s13  ;;  %p1462_p6 = scmp.lt.s32.totalorder %s18_s10, %s18_s10 }
   0xd   :  { %p1463_p7 = scmp.lt.s32.totalorder %s1457_s13, %s1457_s13 }
   0xf   :  { %p1464_p8 = por %p1463_p7, %p1462_p6 }
  0x11   :  { %p1465_p9 = pnand %p1464_p8, %p1458_p5 }
  0x13   :  { %1468 = shalt.err (!%p1465_p9)  }
  0x14   :  { %s1508_s0 = smov [#allocation5]   ;;  %s21_s15 = sshll.u32 %s1769_s2, 4  ;;  %s22_s15 = int_to_ptr.vmem [resolvable:$true] %s21_s15 }
  0x15   :  { %20 = dma.vmem_to_smem %s18_s10, 16, %s1508_s0, [#allocation3] }
  0x16   :  { %s1469_s16 = scalar_lea.vmem %s22_s15, 16  ;;  %p1474_p11 = scmp.lt.s32.totalorder %s22_s15, %s22_s15 }
  0x17   :  { %p1470_p10 = scmp.ne.s32.totalorder %s22_s15, %s1469_s16  ;;  %p1475_p12 = scmp.lt.s32.totalorder %s1469_s16, %s1469_s16 }
  0x19   :  { %p1476_p13 = por %p1475_p12, %p1474_p11 }
  0x1b   :  { %p1477_p0 = pnand %p1476_p13, %p1470_p10 }
  0x1d   :  { %1480 = shalt.err (!%p1477_p0)  }
  0x1e   :  { %s1509_s17 = smov [#allocation6]  }
  0x1f   :  { %24 = dma.vmem_to_smem %s22_s15, 16, %s1509_s17, [#allocation3] }
  0x20   :  { %1493 = dma.done.wait [#allocation3], 48 }
  0x21   :  { %1494 = vsyncadd [#allocation3], 4294967248 }
  0x22   :  { %26 = sfence }
  0x23   :  { %s1566_s18 = smov 0   ;;  %s1568_s19 = smov 0  }
  0x24   :  { %s1570_s20 = smov 0  }
  0x25 LB: > { %s44_s2 = sadd.s32 1, %s1501_s19  ;;  %p1089_p1 = scmp.ge.s32.totalorder %s1505_s20, 1  ;;  %s1505_s20 = sphi %s1570_s20, %s32_s20   ;;  %s1501_s19 = sphi %s1568_s19, %s1773_s19   ;;  %s1497_s18 = sphi %s1566_s18, %s1772_s18  }
  0x26   : > { %p46_p2 = scmp.ge.s32.totalorder %s44_s2, 5  ;;  %p317_p3 = scmp.lt.s32.totalorder %s1505_s20, 6 }
  0x28   : > { %s1775_s2 = smov (%p46_p2, %s44_s2), 0  ;;  %p318_p4 = pnand %p1089_p1, %p317_p3 }
  0x29   : > { %s386_s21 = sld [smem:[#allocation4 + %s1497_s18]] (!%p318_p4)  ;;  %vm456_vm0 = vcmask (!%p318_p4), 261120   ;;  %v1510_v0 = vmov (!%p318_p4), 0.0   ;;  %s1098_s25 = sshll.u32 (!%p318_p4), %s1497_s18, 2 }
  0x2a   : > { %321 = sbr.rel (%p318_p4) target bundleno = 600 (0x258), region = 40  ;;  %s394_s22 = sld [smem:[#allocation5 + %s1497_s18]] (!%p318_p4)  ;;  %457 = vst.msk [vmem:[#allocation2] sm:$0xff] (!%p318_p4), %vm456_vm0, %v1510_v0  ;;  %458 = vst.msk [vmem:[#allocation2 + $0x8] sm:$0xff] (!%p318_p4), %vm456_vm0, %v1510_v0 }
  0x2b   : > { %s410_s23 = sld [smem:[#allocation5 + %s1497_s18]] (!%p318_p4)  ;;  %459 = vst.msk [vmem:[#allocation2 + $0x10] sm:$0xff] (!%p318_p4), %vm456_vm0, %v1510_v0  ;;  %460 = vst.msk [vmem:[#allocation2 + $0x18] sm:$0xff] (!%p318_p4), %vm456_vm0, %v1510_v0  ;;  %p441_p5 = scmp.lt.s32.totalorder (!%p318_p4), %s1098_s25, 19 }
  0x2c   : > { %s426_s24 = sld [smem:[#allocation5 + %s1497_s18]] (!%p318_p4) }
  0x2d   : > { %s461_s26 = sld [smem:[#allocation6 + %s1497_s18]] (!%p318_p4) }
  0x2f   : > { %s1090_s27 = sshll.u32 (!%p318_p4), %s386_s21, 2 }
  0x30   : > { %p398_p6 = scmp.lt.s32.totalorder (!%p318_p4), %s394_s22, 3  ;;  %p388_p7 = scmp.lt.s32.totalorder (!%p318_p4), %s1090_s27, 19 }
  0x31   : > { %s1777_s25 = smov (!%p441_p5, %s1098_s25), 19  ;;  %p414_p8 = scmp.lt.s32.totalorder %s410_s23, 3 }
  0x32   : > { %s1779_s22 = smov (!%p398_p6, %s394_s22), 3  ;;  %s1781_s27 = smov (!%p388_p7, %s1090_s27), 19 }
  0x33   : > { %s1149_s28 = sshll.u32 %s1779_s22, 7  ;;  %p429_p9 = scmp.lt.s32.totalorder %s426_s24, 3 }
  0x34   : > { %s1091_s29 = sshll.u32 %s1781_s27, 3  ;;  %s1591_s10 = scalar_lea.vmem %s1763_s4, %s1149_s28 }
  0x35   : > { %s1596_s13 = scalar_lea.vmem %s1762_s3, %s1091_s29  ;;  %s1099_s0 = sshll.u32 %s1777_s25, 3 }
  0x36   : > { %s1783_s23 = smov (!%p414_p8, %s410_s23), 3  ;;  %s1785_s24 = smov (!%p429_p9, %s426_s24), 3 }
  0x37   : > { %s1150_s1 = sshll.u32 %s1783_s23, 7  ;;  %s1601_s16 = scalar_lea.vmem %s1766_s7, %s1099_s0 }
  0x38   : > { %s1606_s21 = scalar_lea.vmem %s1764_s5, %s1150_s1  ;;  %s1151_s22 = sshll.u32 %s1785_s24, 5 }
  0x39   : > { %s1611_s29 = scalar_lea.vmem %s1765_s6, %s1151_s22  ;;  %s1616_s23 = scalar_lea.vmem %s1767_s8, %s1099_s0 }
  0x3a   : > { %p1102_p10 = scmp.eq.s32.totalorder %s461_s26, 0 }
  0x3b   : > { %v470_v1 = vld [vmem:[%s1591_s10] sm:$0xff] (!%p1102_p10)  ;;  %v471_v2 = vld [vmem:[%s1591_s10 + $0x8] sm:$0xff] (!%p1102_p10)  ;;  %vm1622_vm1 = vmpackc.low (!%p1102_p10), %vm456_vm0, %vm456_vm0  ;;  %v1511_v7 = vmov (!%p1102_p10), 0  }
  0x3c   : > { %465 = sbr.rel (%p1102_p10) target bundleno = 592 (0x250), region = 48  ;;  %v1290_v4 = vpack.c.bf16 (!%p1102_p10), %v471_v2, %v470_v1  ;;  %v472_v5 = vld [vmem:[%s1591_s10 + $0x10] sm:$0xff] (!%p1102_p10)  ;;  %v473_v6 = vld [vmem:[%s1591_s10 + $0x18] sm:$0xff] (!%p1102_p10)  ;;  %1427 = vset.pattern.permute.xlu0 (!%p1102_p10), %v1511_v7  ;;  %1428 = vset.pattern.permute.xlu1 (!%p1102_p10), %v1511_v7  ;;  %v632_v9 = vld [vmem:[%s1606_s21] sm:$0xff] (!%p1102_p10) }
  0x3d   : > { %v1296_v8 = vpack.c.bf16 (!%p1102_p10), %v473_v6, %v472_v5  ;;  %v633_v10 = vld [vmem:[%s1606_s21 + $0x8] sm:$0xff] (!%p1102_p10)  ;;  %v634_v12 = vld [vmem:[%s1606_s21 + $0x10] sm:$0xff] (!%p1102_p10)  ;;  %v635_v13 = vld [vmem:[%s1606_s21 + $0x18] sm:$0xff] (!%p1102_p10) }
  0x3e   : > { %1292 = vmatprep.subr.msk.bf16.mxu0 (!%p1102_p10), %vm1622_vm1, %v1290_v4  ;;  %v1338_v11 = vpack.c.bf16 (!%p1102_p10), %v633_v10, %v632_v9  ;;  %v1344_v14 = vpack.c.bf16 (!%p1102_p10), %v635_v13, %v634_v12  ;;  %v474_v15 = vld [vmem:[%s1591_s10 + $0x20] sm:$0xff] (!%p1102_p10)  ;;  %v475_v16 = vld [vmem:[%s1591_s10 + $0x28] sm:$0xff] (!%p1102_p10)  ;;  %v476_v24 = vld [vmem:[%s1591_s10 + $0x30] sm:$0xff] (!%p1102_p10) }
  0x3f   : > { %1295 = vmatpush3.bf16.xpose.msk.msra.mxu0 (!%p1102_p10), %vm1622_vm1, %v1290_v4  ;;  %v1302_v17 = vpack.c.bf16 (!%p1102_p10), %v475_v16, %v474_v15  ;;  %v636_v18 = vld [vmem:[%s1606_s21 + $0x20] sm:$0xff] (!%p1102_p10)  ;;  %v637_v19 = vld [vmem:[%s1606_s21 + $0x28] sm:$0xff] (!%p1102_p10)  ;;  %v477_v25 = vld [vmem:[%s1591_s10 + $0x38] sm:$0xff] (!%p1102_p10) }
  0x40   : > { %1298 = vmatprep.subr.msk.bf16.mxu0 (!%p1102_p10), %vm1622_vm1, %v1296_v8  ;;  %1340 = vmatprep.subr.msk.bf16.mxu1 (!%p1102_p10), %vm1622_vm1, %v1338_v11  ;;  %v466_v20 = vld [vmem:[%s1596_s13] sm:$0xff] (!%p1102_p10)  ;;  %v1350_v21 = vpack.c.bf16 (!%p1102_p10), %v637_v19, %v636_v18  ;;  %v814_v23 = vld [vmem:[%s1601_s16 + $0x8] sm:$0xff] (!%p1102_p10)  ;;  %v815_v26 = vld [vmem:[%s1601_s16 + $0x10] sm:$0xff] (!%p1102_p10)  ;;  %v1308_v28 = vpack.c.bf16 (!%p1102_p10), %v477_v25, %v476_v24 }
  0x41   : > { %1343 = vmatpush3.bf16.xpose.msk.msra.mxu1 (!%p1102_p10), %vm1622_vm1, %v1338_v11  ;;  %1232 = vmatprep.mubr.msk.f32.mxu0 (!%p1102_p10), %vm456_vm0, %v466_v20  ;;  %v813_v22 = vld [vmem:[%s1601_s16] sm:$0xff] (!%p1102_p10)  ;;  %v816_v27 = vld [vmem:[%s1601_s16 + $0x18] sm:$0xff] (!%p1102_p10)  ;;  %v638_v29 = vld [vmem:[%s1606_s21 + $0x30] sm:$0xff] (!%p1102_p10) }
  0x42   : > { %1346 = vmatprep.subr.msk.bf16.mxu1 (!%p1102_p10), %vm1622_vm1, %v1344_v14  ;;  %1270 = vmatprep.mubr.msk.f32.mxu1 (!%p1102_p10), %vm456_vm0, %v466_v20  ;;  %v639_v30 = vld [vmem:[%s1606_s21 + $0x38] sm:$0xff] (!%p1102_p10)  ;;  %v478_v32 = vld [vmem:[%s1591_s10 + $0x40] sm:$0xff] (!%p1102_p10)  ;;  %v479_v33 = vld [vmem:[%s1591_s10 + $0x48] sm:$0xff] (!%p1102_p10) }
  0x43   : > { %819 = vperm.xlu0 %1427, %v813_v22   ;;  %824 = vperm.xlu1 %1428, %v814_v23   ;;  %v1356_v31 = vpack.c.bf16 %v639_v30, %v638_v29  ;;  %v1314_v34 = vpack.c.bf16 %v479_v33, %v478_v32  ;;  %v640_v35 = vld [vmem:[%s1606_s21 + $0x40] sm:$0xff]  ;;  %v641_v36 = vld [vmem:[%s1606_s21 + $0x48] sm:$0xff]  ;;  %v480_v38 = vld [vmem:[%s1591_s10 + $0x50] sm:$0xff] }
  0x44   : > { %v1362_v37 = vpack.c.bf16 %v641_v36, %v640_v35  ;;  %v481_v39 = vld [vmem:[%s1591_s10 + $0x58] sm:$0xff]  ;;  %v642_v41 = vld [vmem:[%s1606_s21 + $0x50] sm:$0xff]  ;;  %v482_v44 = vld [vmem:[%s1591_s10 + $0x60] sm:$0xff] }
  0x45   : > { %v1320_v40 = vpack.c.bf16 %v481_v39, %v480_v38  ;;  %v643_v42 = vld [vmem:[%s1606_s21 + $0x58] sm:$0xff]  ;;  %v483_v45 = vld [vmem:[%s1591_s10 + $0x68] sm:$0xff]  ;;  %v644_v47 = vld [vmem:[%s1606_s21 + $0x60] sm:$0xff] }
  0x46   : > { %v1368_v43 = vpack.c.bf16 %v643_v42, %v642_v41  ;;  %v1326_v46 = vpack.c.bf16 %v483_v45, %v482_v44  ;;  %v645_v48 = vld [vmem:[%s1606_s21 + $0x68] sm:$0xff]  ;;  %v484_v50 = vld [vmem:[%s1591_s10 + $0x70] sm:$0xff]  ;;  %v485_v51 = vld [vmem:[%s1591_s10 + $0x78] sm:$0xff] }
  0x47   : > { %1301 = vmatpush3.bf16.xpose.msk.msra.mxu0 %vm1622_vm1, %v1296_v8  ;;  %829 = vperm.xlu0 %1427, %v815_v26   ;;  %v1374_v49 = vpack.c.bf16 %v645_v48, %v644_v47  ;;  %v1332_v52 = vpack.c.bf16 %v485_v51, %v484_v50  ;;  %v646_v53 = vld [vmem:[%s1606_s21 + $0x70] sm:$0xff]  ;;  %v647_v54 = vld [vmem:[%s1606_s21 + $0x78] sm:$0xff]  ;;  %v467_v56 = vld [vmem:[%s1596_s13 + $0x8] sm:$0xff] }
  0x48   : > { %1304 = vmatprep.subr.msk.bf16.mxu0 %vm1622_vm1, %v1302_v17  ;;  %834 = vperm.xlu1 %1428, %v816_v27   ;;  %v1380_v55 = vpack.c.bf16 %v647_v54, %v646_v53  ;;  %v468_v57 = vld [vmem:[%s1596_s13 + $0x10] sm:$0xff]  ;;  %v469_v58 = vld [vmem:[%s1596_s13 + $0x18] sm:$0xff]  ;;  %v845_v59 = vld [vmem:[%s1611_s29] sm:$0xff] }
  0x49   : > { %1349 = vmatpush3.bf16.xpose.msk.msra.mxu1 %vm1622_vm1, %v1344_v14  ;;  %v846_v60 = vld [vmem:[%s1611_s29 + $0x8] sm:$0xff]  ;;  %v847_v62 = vld [vmem:[%s1611_s29 + $0x10] sm:$0xff]  ;;  %v848_v63 = vld [vmem:[%s1611_s29 + $0x18] sm:$0xff] }
  0x4a   : > { %1352 = vmatprep.subr.msk.bf16.mxu1 %vm1622_vm1, %v1350_v21  ;;  %v1386_v61 = vpack.c.bf16 %v846_v60, %v845_v59  ;;  %v1390_v0 = vpack.c.bf16 %v848_v63, %v847_v62  ;;  %v842_v41 = vld [vmem:[#allocation2 + $0x8] sm:$0xff]  ;;  %v841_v42 = vld [vmem:[#allocation2] sm:$0xff]  ;;  %v844_v47 = vld [vmem:[#allocation2 + $0x18] sm:$0xff] }
  0x4b   : > { %v843_v48 = vld [vmem:[#allocation2 + $0x10] sm:$0xff] }
  0x4f   : > { %1307 = vmatpush3.bf16.xpose.msk.msra.mxu0 %vm1622_vm1, %v1302_v17 }
  0x50   : > { %1310 = vmatprep.subr.msk.bf16.mxu0 %vm1622_vm1, %v1308_v28 }
  0x51   : > { %1355 = vmatpush3.bf16.xpose.msk.msra.mxu1 %vm1622_vm1, %v1350_v21 }
  0x52   : > { %1358 = vmatprep.subr.msk.bf16.mxu1 %vm1622_vm1, %v1356_v31 }
  0x57   : > { %1313 = vmatpush3.bf16.xpose.msk.msra.mxu0 %vm1622_vm1, %v1308_v28 }
  0x58   : > { %1316 = vmatprep.subr.msk.bf16.mxu0 %vm1622_vm1, %v1314_v34 }
  0x59   : > { %1361 = vmatpush3.bf16.xpose.msk.msra.mxu1 %vm1622_vm1, %v1356_v31 }
  0x5a   : > { %1364 = vmatprep.subr.msk.bf16.mxu1 %vm1622_vm1, %v1362_v37 }
  0x5f   : > { %1319 = vmatpush3.bf16.xpose.msk.msra.mxu0 %vm1622_vm1, %v1314_v34 }
  0x60   : > { %1322 = vmatprep.subr.msk.bf16.mxu0 %vm1622_vm1, %v1320_v40 }
  0x61   : > { %1367 = vmatpush3.bf16.xpose.msk.msra.mxu1 %vm1622_vm1, %v1362_v37 }
  0x62   : > { %1370 = vmatprep.subr.msk.bf16.mxu1 %vm1622_vm1, %v1368_v43 }
  0x67   : > { %1325 = vmatpush3.bf16.xpose.msk.msra.mxu0 %vm1622_vm1, %v1320_v40 }
  0x68   : > { %1328 = vmatprep.subr.msk.bf16.mxu0 %vm1622_vm1, %v1326_v46 }
  0x69   : > { %1373 = vmatpush3.bf16.xpose.msk.msra.mxu1 %vm1622_vm1, %v1368_v43 }
  0x6a   : > { %1376 = vmatprep.subr.msk.bf16.mxu1 %vm1622_vm1, %v1374_v49 }
  0x6f   : > { %1331 = vmatpush3.bf16.xpose.msk.msra.mxu0 %vm1622_vm1, %v1326_v46 }
  0x70   : > { %1334 = vmatprep.subr.msk.bf16.mxu0 %vm1622_vm1, %v1332_v52 }
  0x71   : > { %1379 = vmatpush3.bf16.xpose.msk.msra.mxu1 %vm1622_vm1, %v1374_v49 }
  0x72   : > { %1382 = vmatprep.subr.msk.bf16.mxu1 %vm1622_vm1, %v1380_v55 }
  0x77   : > { %1337 = vmatpush3.bf16.xpose.msk.msra.mxu0 %vm1622_vm1, %v1332_v52 }
  0x78   : > { %1387 = vmatprep.subr.bf16.mxu0 %v1386_v61 }
  0x79   : > { %1385 = vmatpush3.bf16.xpose.msk.msra.mxu1 %vm1622_vm1, %v1380_v55 }
  0x7a   : > { %1394 = vmatprep.subr.bf16.mxu1 %v1386_v61 }
  0x7e   : > { %1233 = vmatmul.mubr.msk.f32.vlgmr.msra.gmra.mrb[0].mxu0 %vm456_vm0, %v467_v56 }
  0x7f   : > { %1235 = vmatprep.mubr.msk.f32.mxu0 %vm456_vm0, %v468_v57  ;;  %1389 = vmatpush3.bf16.xpose.msra.mxu0 %v1386_v61 }
  0x80   : > { %1271 = vmatmul.mubr.msk.f32.vlgmr.msra.gmra.mrb[0].mxu1 %vm456_vm0, %v467_v56  ;;  %1391 = vmatprep.subr.bf16.mxu0 %v1390_v0 }
  0x81   : > { %1273 = vmatprep.mubr.msk.f32.mxu1 %vm456_vm0, %v468_v57  ;;  %1396 = vmatpush3.bf16.xpose.msra.mxu1 %v1386_v61 }
  0x82   : > { %1236 = vmatmul.mubr.msk.f32.gmra.mrb[2].mxu0 %vm456_vm0, %v469_v58  ;;  %1395 = vmatprep.subr.bf16.mxu1 %v1390_v0 }
  0x84   : > { %1274 = vmatmul.mubr.msk.f32.gmra.mrb[2].mxu1 %vm456_vm0, %v469_v58 }
  0x87   : > { %1393 = vmatpush3.bf16.xpose.msra.mxu0 %v1390_v0 }
  0x89   : > { %1397 = vmatpush3.bf16.xpose.msra.mxu1 %v1390_v0 }
  0xc2   : > { %v820_v25 = vpop.permute.xlu0 %819  ;;  %v825_v28 = vpop.permute.xlu1 %824 }
  0xc6   : > { %v830_v37 = vpop.permute.xlu0 %829 }
  0xc7   : > { %v835_v38 = vpop.permute.xlu1 %834 }
 0x151   : > { %v1234_v1 = vpop.f32.mrb[0].mxu0 }
 0x152   : > { %v1144_v2 = vmul.f32 -1.442695, %v1234_v1  ;;  %v613_v3 = vpop.f32.mrb[1].mxu0 }
 0x153   : > { %v1143_v4 = vmul.f32 -1.442695, %v613_v3  ;;  %v1272_v5 = vpop.f32.mrb[0].mxu1 }
 0x154   : > { %1429 = vpow2.f32 %v1144_v2  ;;  %v762_v7 = vpop.f32.mrb[1].mxu1 }
 0x155   : > { %1431 = vpow2.f32 %v1143_v4  ;;  %v1237_v6 = vpop.f32.mrb[2].mxu0 }
 0x156   : > { %v1146_v8 = vmul.f32 -1.442695, %v1237_v6  ;;  %v623_v9 = vpop.f32.mrb[3].mxu0 }
 0x157   : > { %v1145_v10 = vmul.f32 -1.442695, %v623_v9  ;;  %v1275_v11 = vpop.f32.mrb[2].mxu1 }
 0x158   : > { %1433 = vpow2.f32 %v1146_v8  ;;  %v772_v12 = vpop.f32.mrb[3].mxu1 }
 0x159   : > { %1435 = vpow2.f32 %v1145_v10 }
 0x15e   : > { %v1430_v13 = vpop.eup %1429 }
 0x15f   : > { %v1432_v14 = vpop.eup %1431  ;;  %v794_v15 = vadd.f32 1.0, %v1430_v13 }
 0x160   : > { %v793_v16 = vadd.f32 1.0, %v1432_v14 }
 0x161   : > { %1437 = vrcp.f32 %v794_v15 }
 0x162   : > { %v1434_v17 = vpop.eup %1433  ;;  %1439 = vrcp.f32 %v793_v16 }
 0x163   : > { %v1436_v18 = vpop.eup %1435  ;;  %v796_v19 = vadd.f32 1.0, %v1434_v17 }
 0x164   : > { %v795_v20 = vadd.f32 1.0, %v1436_v18 }
 0x165   : > { %1441 = vrcp.f32 %v796_v19 }
 0x166   : > { %1443 = vrcp.f32 %v795_v20 }
 0x16b   : > { %v1438_v21 = vpop.eup %1437 }
 0x16c   : > { %v1440_v22 = vpop.eup %1439  ;;  %v806_v23 = vmul.f32 %v1438_v21, %v1234_v1 }
 0x16d   : > { %v805_v24 = vmul.f32 %v1440_v22, %v613_v3 }
 0x16e   : > { %v810_v26 = vmul.f32 %v1272_v5, %v806_v23 }
 0x16f   : > { %v1442_v27 = vpop.eup %1441  ;;  %v809_v29 = vmul.f32 %v805_v24, %v762_v7 }
 0x170   : > { %v1444_v30 = vpop.eup %1443  ;;  %v808_v31 = vmul.f32 %v1442_v27, %v1237_v6  ;;  %v838_v34 = vmul.f32 %v825_v28, %v810_v26 }
 0x171   : > { %v807_v32 = vmul.f32 %v1444_v30, %v623_v9  ;;  %v837_v33 = vmul.f32 %v820_v25, %v809_v29 }
 0x172   : > { %v812_v35 = vmul.f32 %v1275_v11, %v808_v31 }
 0x173   : > { %v811_v36 = vmul.f32 %v807_v32, %v772_v12  ;;  %1284 = vmatprep.mubr.f32.mxu0 %v837_v33 }
 0x174   : > { %1285 = vmatmul.mubr.f32.vlgmr.msra.gmra.mrb[4].mxu0 %v838_v34  ;;  %v840_v40 = vmul.f32 %v835_v38, %v812_v35 }
 0x175   : > { %v839_v39 = vmul.f32 %v830_v37, %v811_v36 }
 0x177   : > { %1287 = vmatprep.mubr.f32.mxu1 %v839_v39 }
 0x178   : > { %1288 = vmatmul.mubr.f32.vlgmr.msra.gmra.mrb[4].mxu1 %v840_v40 }
 0x247   : > { %v1286_v43 = vpop.f32.mrb[4].mxu0 }
 0x248   : > { %v935_v44 = vadd.f32 %v1286_v43, %v842_v41  ;;  %v915_v45 = vpop.f32.mrb[5].mxu0 }
 0x249   : > { %v934_v46 = vadd.f32 %v915_v45, %v841_v42 }
 0x24a   : > { %939 = vst.msk [vmem:[#allocation2 + $0x8] sm:$0xff] %vm456_vm0, %v935_v44 }
 0x24b   : > { %938 = vst.msk [vmem:[#allocation2] sm:$0xff] %vm456_vm0, %v934_v46  ;;  %v1289_v49 = vpop.f32.mrb[4].mxu1 }
 0x24c   : > { %v937_v50 = vadd.f32 %v1289_v49, %v844_v47  ;;  %v925_v51 = vpop.f32.mrb[5].mxu1 }
 0x24d   : > { %v936_v52 = vadd.f32 %v925_v51, %v843_v48 }
 0x24e   : > { %941 = vst.msk [vmem:[#allocation2 + $0x18] sm:$0xff] %vm456_vm0, %v937_v50 }
 0x24f   : > { %940 = vst.msk [vmem:[#allocation2 + $0x10] sm:$0xff] %vm456_vm0, %v936_v52 }
 0x250 PF:  {}
 0x251   : > { %v946_v54 = vld [vmem:[#allocation2 + $0x8] sm:$0xff] }
 0x252   : > { %v945_v53 = vld [vmem:[#allocation2] sm:$0xff]  ;;  %951 = vst.msk [vmem:[%s1616_s23 + $0x8] sm:$0xff] %vm456_vm0, %v946_v54 }
 0x253   : > { %950 = vst.msk [vmem:[%s1616_s23] sm:$0xff] %vm456_vm0, %v945_v53 }
 0x255   : > { %v948_v56 = vld [vmem:[#allocation2 + $0x18] sm:$0xff] }
 0x256   : > { %v947_v55 = vld [vmem:[#allocation2 + $0x10] sm:$0xff]  ;;  %953 = vst.msk [vmem:[%s1616_s23 + $0x18] sm:$0xff] %vm456_vm0, %v948_v56 }
 0x257   : > { %952 = vst.msk [vmem:[%s1616_s23 + $0x10] sm:$0xff] %vm456_vm0, %v947_v55 }
 0x258 PF: > { %s32_s20 = sadd.s32 1, %s1505_s20   ;;  %s1772_s18 = smov %s1501_s19 }
 0x259   : > { %p29_p11 = scmp.ge.s32.totalorder %s32_s20, 7   ;;  %s1773_s19 = smov %s1775_s2 }
 0x25b   :  { %31 = sbr.rel (!%p29_p11) target bundleno = 37 (0x25), region = 94 }

</bundles_post_ra>
